<compile_context>
chip_gen: v7x
topology: tpu7x:2x2x1
jax: 0.10.0
libtpu: 0.0.40
codegen_flags: <defaults>
</compile_context>

<pallas_src>
import functools

import jax
import jax.numpy as jnp
from jax.experimental import pallas as pl
from jax.experimental.pallas import tpu as pltpu


def _round_up(x, m):
    return (x + m - 1) // m * m


def _patch_embed_kernel(p_ref, w_ref, b_ref, o_ref):
    # p_ref: (TM, K) streamed patch tile
    # w_ref: (C_out_p, K) VMEM-resident weight (OIHW flattened, not transposed)
    # b_ref: (1, C_out_p) f32 bias
    # o_ref: (TM, C_out_p)
    acc = jax.lax.dot_general(
        p_ref[...], w_ref[...],
        dimension_numbers=(((1,), (1,)), ((), ())),   # contract K with K (trans_b)
        preferred_element_type=jnp.float32)
    o_ref[...] = (acc + b_ref[...]).astype(o_ref.dtype)


def _choose_tm(M, K, C_out_p, in_bytes, out_bytes, budget_bytes=24 << 20):
    """Largest MXU-aligned row tile whose double-buffered working set fits budget."""
    resident = C_out_p * K * in_bytes + C_out_p * 4            # weight + f32 bias
    per_row = 2 * K * in_bytes + 2 * C_out_p * out_bytes       # dbl-buffered in + out
    cap = max(128, (budget_bytes - resident) // max(per_row, 1))
    cap = (cap // 256) * 256 if cap >= 256 else 128            # 256-align (v6e/v7x MXU)
    cap = min(cap, 2048)                                       # amortizes ~0.35us/step
    if M <= cap:
        return M          # single tile; block == full extent is always legal
    return cap


@functools.partial(jax.jit, static_argnames=("patch_size", "compute_dtype"))
def equation1_layer_forward(x, weight, bias, *, patch_size, compute_dtype=None):
    """Forward of equation1_layer.

    x:      (B, C_in, H, W) NCHW   weight: (C_out, C_in, P, P)   bias: (C_out,)
    returns (B, N, C_out), N = (H//P)*(W//P)
    """
    B, C_in, H, W = x.shape
    P = patch_size
    C_out = weight.shape[0]
    Hp, Wp = H // P, W // P
    N = Hp * Wp
    K = C_in * P * P
    M = B * N

    # Conv2d with stride=P silently drops trailing rows/cols that do not fill a
    # full patch; match that by truncating (no-op when H, W divisible by P).
    x = x[:, :, :Hp * P, :Wp * P]

    cdtype = jnp.dtype(compute_dtype) if compute_dtype is not None else x.dtype
    out_dtype = x.dtype

    # --- glue: extract non-overlapping PxP patches -> (M, K) ----------------
    # K ordering (c, p, q) matches the OIHW weight reshape below.
    patches = x.reshape(B, C_in, Hp, P, Wp, P)
    patches = patches.transpose(0, 2, 4, 1, 3, 5)              # (B, Hp, Wp, C_in, P, P)
    patches = patches.reshape(M, K).astype(cdtype)

    # Lane-dense output: pad C_out up to a multiple of 128 (sliced off below).
    C_out_p = _round_up(C_out, 128)
    w_mat = weight.reshape(C_out, K).astype(cdtype)            # (C_out, K), no transpose
    if C_out_p != C_out:
        w_mat = jnp.pad(w_mat, ((0, C_out_p - C_out), (0, 0)))
    b_row = jnp.pad(bias.astype(jnp.float32),
                    (0, C_out_p - C_out)).reshape(1, C_out_p)

    in_bytes = jnp.dtype(cdtype).itemsize
    out_bytes = jnp.dtype(out_dtype).itemsize
    TM = _choose_tm(M, K, C_out_p, in_bytes, out_bytes)
    num_m = pl.cdiv(M, TM)

    vmem_needed = (2 * TM * K * in_bytes          # double-buffered patch tiles
                   + C_out_p * K * in_bytes       # resident weight
                   + C_out_p * 4                  # resident bias
                   + 2 * TM * C_out_p * out_bytes)  # double-buffered output tiles
    vmem_limit = int(min(max(4 * vmem_needed, 16 << 20), 48 << 20))

    out = pl.pallas_call(
        _patch_embed_kernel,
        out_shape=jax.ShapeDtypeStruct((M, C_out_p), out_dtype),
        grid=(num_m,),
        in_specs=[
            pl.BlockSpec((TM, K), lambda i: (i, 0)),           # streamed row tiles
            pl.BlockSpec((C_out_p, K), lambda i: (0, 0)),      # resident weight
            pl.BlockSpec((1, C_out_p), lambda i: (0, 0)),      # resident bias
        ],
        out_specs=pl.BlockSpec((TM, C_out_p), lambda i: (i, 0)),
        compiler_params=pltpu.CompilerParams(
            dimension_semantics=("parallel",),                 # megacore-shardable
            vmem_limit_bytes=vmem_limit,
            allow_input_fusion=[True, False, False],           # fuse patch relayout into DMA
        ),
        cost_estimate=pl.CostEstimate(
            flops=2 * M * K * C_out_p,
            bytes_accessed=(M * K * in_bytes
                            + C_out_p * K * in_bytes
                            + M * C_out_p * out_bytes),
            transcendentals=0),
    )(patches, w_mat, b_row)

    return out[:, :C_out].reshape(B, N, C_out)


def _reference(x, weight, bias, patch_size):
    # Pure-JAX reference using a real convolution, for correctness checking.
    y = jax.lax.conv_general_dilated(
        x, weight,
        window_strides=(patch_size, patch_size),
        padding="VALID",
        dimension_numbers=("NCHW", "OIHW", "NCHW"),
    ) + bias.reshape(1, -1, 1, 1)
    B, C_out, Hp, Wp = y.shape
    return y.reshape(B, C_out, Hp * Wp).transpose(0, 2, 1)


if __name__ == "__main__":
    # Small shapes consistent with the module's forward.
    B, C_in, H, W = 2, 4, 16, 16
    patch_size = 4
    C_out = 32

    key = jax.random.PRNGKey(0)
    kx, kw, kb = jax.random.split(key, 3)
    x = jax.random.normal(kx, (B, C_in, H, W), dtype=jnp.float32)
    # Deterministic synthetic params (Conv2d weight layout OIHW).
    weight = jax.random.normal(kw, (C_out, C_in, patch_size, patch_size),
                               dtype=jnp.float32) * 0.05
    bias = jax.random.normal(kb, (C_out,), dtype=jnp.float32) * 0.05

    ref = _reference(x, weight, bias, patch_size)
    N = (H // patch_size) * (W // patch_size)

    # f32 path (matches PyTorch numerics).
    out = equation1_layer_forward(x, weight, bias, patch_size=patch_size)
    out = jax.block_until_ready(out)
    assert out.shape == (B, N, C_out)
    assert jnp.allclose(out, ref, atol=1e-4, rtol=1e-4)

    # bf16 compute path (f32 MXU accumulation) — the fast path on v5e/v6e/v7x.
    out_bf16 = equation1_layer_forward(x, weight, bias, patch_size=patch_size,
                                       compute_dtype=jnp.bfloat16)
    out_bf16 = jax.block_until_ready(out_bf16)
    assert out_bf16.shape == (B, N, C_out)
    assert jnp.allclose(out_bf16, ref, atol=3e-2, rtol=3e-2)

    print("KERNEL_OK")
</pallas_src>

<mosaic_0001>
module attributes {stable_mosaic.version = 11 : i64} {
  func.func @_patch_embed_kernel(%arg0: i32, %arg1: memref<32x64xf32, #tpu.memory_space<vmem>>, %arg2: memref<128x64xf32, #tpu.memory_space<vmem>>, %arg3: memref<1x128xf32, #tpu.memory_space<vmem>>, %arg4: memref<32x128xf32, #tpu.memory_space<vmem>>) attributes {dimension_semantics = [#tpu.dimension_semantics<parallel>], iteration_bounds = array<i64: 1>, scalar_prefetch = 0 : i64, scratch_operands = 0 : i64, tpu.core_type = #tpu.core_type<tc>, window_params = [{transform_indices = @transform_0, window_bounds = array<i64: 32, 64>}, {pipeline_mode = #tpu.pipeline_mode<synchronous>, transform_indices = @transform_1, window_bounds = array<i64: 128, 64>}, {pipeline_mode = #tpu.pipeline_mode<synchronous>, transform_indices = @transform_2, window_bounds = array<i64: 1, 128>}, {transform_indices = @transform_3, window_bounds = array<i64: 32, 128>}]} {
    %c0 = arith.constant 0 : index
    %c0_0 = arith.constant 0 : index
    %0 = vector.load %arg1[%c0, %c0_0] : memref<32x64xf32, #tpu.memory_space<vmem>>, vector<32x64xf32>
    %c0_1 = arith.constant 0 : index
    %c0_2 = arith.constant 0 : index
    %1 = vector.load %arg2[%c0_1, %c0_2] : memref<128x64xf32, #tpu.memory_space<vmem>>, vector<128x64xf32>
    %cst = arith.constant dense<0.000000e+00> : vector<32x128xf32>
    %2 = tpu.matmul %0, %1, %cst {dimension_numbers = #tpu.dot_dimension_numbers<[1], [1], [0], [0], [0, 0, 1, 0], [], []>} : vector<32x64xf32>, vector<128x64xf32>, vector<32x128xf32> -> vector<32x128xf32>
    %c0_3 = arith.constant 0 : index
    %c0_4 = arith.constant 0 : index
    %3 = vector.load %arg3[%c0_3, %c0_4] : memref<1x128xf32, #tpu.memory_space<vmem>>, vector<1x128xf32>
    %4 = vector.broadcast %3 : vector<1x128xf32> to vector<32x128xf32>
    %5 = arith.addf %2, %4 : vector<32x128xf32>
    %c0_5 = arith.constant 0 : index
    %c0_6 = arith.constant 0 : index
    %6 = vector.load %arg4[%c0_5, %c0_6] : memref<32x128xf32, #tpu.memory_space<vmem>>, vector<32x128xf32>
    tpu.vector_store %arg4[%c0_5, %c0_6], %5 {strides = array<i32>} : memref<32x128xf32, #tpu.memory_space<vmem>>, vector<32x128xf32>,
    return
  }
  func.func @transform_0(%arg0: i32) -> (i32, i32) {
    %c0_i32 = arith.constant 0 : i32
    %c0_i32_0 = arith.constant 0 : i32
    return %arg0, %c0_i32 : i32, i32
  }
  func.func @transform_1(%arg0: i32) -> (i32, i32) {
    %c0_i32 = arith.constant 0 : i32
    %c0_i32_0 = arith.constant 0 : i32
    %c0_i32_1 = arith.constant 0 : i32
    return %c0_i32, %c0_i32_0 : i32, i32
  }
  func.func @transform_2(%arg0: i32) -> (i32, i32) {
    %c0_i32 = arith.constant 0 : i32
    %c0_i32_0 = arith.constant 0 : i32
    %c0_i32_1 = arith.constant 0 : i32
    return %c0_i32, %c0_i32_0 : i32, i32
  }
  func.func @transform_3(%arg0: i32) -> (i32, i32) {
    %c0_i32 = arith.constant 0 : i32
    %c0_i32_0 = arith.constant 0 : i32
    return %arg0, %c0_i32 : i32, i32
  }
}

</mosaic_0001>

<bundles_post_ra>
// kernel: equation1_layer_forward.1
= control target key start
LH: loop header
LB: loop body
LE: loop exit
PB: predicated region body
PF: predicated region fallthrough
CT: control target
= control target key end

     0   :  { %vm42_vm0 = vcmask 523264   ;;  %s550_s0 = inlined_call_operand.vmem [shape: f32[32,64], index: 0, kind: input, shape index: {}]   ;;  %s551_s1 = inlined_call_operand.vmem [shape: f32[128,64], index: 1, kind: input, shape index: {}]   ;;  %s552_s2 = inlined_call_operand.vmem [shape: f32[1,128], index: 2, kind: input, shape index: {}]   ;;  %s553_s3 = inlined_call_operand.hbm [shape: f32[32,128], index: 3, kind: output, shape index: {}]  }
   0x1   :  { %v19_v0 = vld [vmem:[%s551_s1] sm:$0xff]  ;;  %v20_v1 = vld [vmem:[%s551_s1 + $0x8] sm:$0xff]  ;;  %v21_v2 = vld [vmem:[%s551_s1 + $0x10] sm:$0xff] }
   0x2   :  { %v287_v3 = vpack.c.bf16 %v20_v1, %v19_v0  ;;  %vm412_vm1 = vmpackc.low %vm42_vm0, %vm42_vm0  ;;  %v22_v5 = vld [vmem:[%s551_s1 + $0x18] sm:$0xff]  ;;  %v15_v7 = vld [vmem:[%s550_s0] sm:$0xff] }
   0x3   :  { %v293_v6 = vpack.c.bf16 %v22_v5, %v21_v2  ;;  %v23_v8 = vld [vmem:[%s551_s1 + $0x20] sm:$0xff]  ;;  %v24_v9 = vld [vmem:[%s551_s1 + $0x28] sm:$0xff]  ;;  %281 = vmatprep.mubr.msk.f32.mxu0 %vm42_vm0, %v15_v7  ;;  %v17_v10 = vld [vmem:[%s550_s0 + $0x10] sm:$0xff] }
   0x4   :  { %289 = vmatprep.subr.msk.bf16.mxu0 %vm412_vm1, %v287_v3  ;;  %335 = vmatprep.subr.msk.bf16.mxu1 %vm412_vm1, %v287_v3 }
   0x5   :  { %292 = vmatpush3.bf16.xpose.msk.msra.mxu0 %vm412_vm1, %v287_v3  ;;  %343 = vmatpush3.bf16.xpose.msk.msra.mxu1 %vm412_vm1, %v287_v3 }
   0x6   :  { %295 = vmatprep.subr.msk.bf16.mxu0 %vm412_vm1, %v293_v6  ;;  %336 = vmatprep.subr.msk.bf16.mxu1 %vm412_vm1, %v293_v6 }
   0x7   :  { %284 = vmatprep.mubr.msk.f32.mxu1 %vm42_vm0, %v17_v10 }
   0x8   :  { %8 = vsyncpa [#allocation3], 0  ;;  %v299_v11 = vpack.c.bf16 %v24_v9, %v23_v8  ;;  %v25_v12 = vld [vmem:[%s551_s1 + $0x30] sm:$0xff]  ;;  %v26_v13 = vld [vmem:[%s551_s1 + $0x38] sm:$0xff]  ;;  %s378_s26 = smov [#allocation2]  }
   0x9   :  { %v305_v14 = vpack.c.bf16 %v26_v13, %v25_v12  ;;  %v27_v15 = vld [vmem:[%s551_s1 + $0x40] sm:$0xff]  ;;  %v28_v16 = vld [vmem:[%s551_s1 + $0x48] sm:$0xff]  ;;  %v29_v18 = vld [vmem:[%s551_s1 + $0x50] sm:$0xff]  ;;  %s197_s27 = sshll.u32 %s378_s26, 4  ;;  %s198_s27 = int_to_ptr.vmem [resolvable:$true] %s197_s27 }
   0xa   :  { %v311_v17 = vpack.c.bf16 %v28_v16, %v27_v15  ;;  %v30_v19 = vld [vmem:[%s551_s1 + $0x58] sm:$0xff]  ;;  %v31_v21 = vld [vmem:[%s551_s1 + $0x60] sm:$0xff]  ;;  %v32_v22 = vld [vmem:[%s551_s1 + $0x68] sm:$0xff]  ;;  %p359_p1 = scmp.lt.s32.totalorder %s198_s27, %s198_s27 }
   0xb   :  { %v317_v20 = vpack.c.bf16 %v30_v19, %v29_v18  ;;  %v323_v23 = vpack.c.bf16 %v32_v22, %v31_v21  ;;  %v33_v24 = vld [vmem:[%s551_s1 + $0x70] sm:$0xff]  ;;  %v34_v25 = vld [vmem:[%s551_s1 + $0x78] sm:$0xff]  ;;  %v16_v27 = vld [vmem:[%s550_s0 + $0x8] sm:$0xff] }
   0xc   :  { %v329_v26 = vpack.c.bf16 %v34_v25, %v33_v24  ;;  %v18_v28 = vld [vmem:[%s550_s0 + $0x18] sm:$0xff]  ;;  %v208_v29 = vld [vmem:[%s552_s2] ss:$0 sm:$0xff]  ;;  %s354_s0 = scalar_lea.vmem %s198_s27, 512 }
   0xd   :  { %298 = vmatpush3.bf16.xpose.msk.msra.mxu0 %vm412_vm1, %v293_v6  ;;  %344 = vmatpush3.bf16.xpose.msk.msra.mxu1 %vm412_vm1, %v293_v6  ;;  %p355_p0 = scmp.ne.s32.totalorder %s198_s27, %s354_s0  ;;  %p360_p2 = scmp.lt.s32.totalorder %s354_s0, %s354_s0 }
   0xe   :  { %301 = vmatprep.subr.msk.bf16.mxu0 %vm412_vm1, %v299_v11  ;;  %337 = vmatprep.subr.msk.bf16.mxu1 %vm412_vm1, %v299_v11 }
   0xf   :  { %p361_p3 = por %p360_p2, %p359_p1 }
  0x11   :  { %p362_p4 = pnand %p361_p3, %p355_p0 }
  0x15   :  { %304 = vmatpush3.bf16.xpose.msk.msra.mxu0 %vm412_vm1, %v299_v11  ;;  %345 = vmatpush3.bf16.xpose.msk.msra.mxu1 %vm412_vm1, %v299_v11 }
  0x16   :  { %307 = vmatprep.subr.msk.bf16.mxu0 %vm412_vm1, %v305_v14  ;;  %338 = vmatprep.subr.msk.bf16.mxu1 %vm412_vm1, %v305_v14 }
  0x1d   :  { %310 = vmatpush3.bf16.xpose.msk.msra.mxu0 %vm412_vm1, %v305_v14  ;;  %346 = vmatpush3.bf16.xpose.msk.msra.mxu1 %vm412_vm1, %v305_v14 }
  0x1e   :  { %313 = vmatprep.subr.msk.bf16.mxu0 %vm412_vm1, %v311_v17  ;;  %339 = vmatprep.subr.msk.bf16.mxu1 %vm412_vm1, %v311_v17 }
  0x25   :  { %316 = vmatpush3.bf16.xpose.msk.msra.mxu0 %vm412_vm1, %v311_v17  ;;  %347 = vmatpush3.bf16.xpose.msk.msra.mxu1 %vm412_vm1, %v311_v17 }
  0x26   :  { %319 = vmatprep.subr.msk.bf16.mxu0 %vm412_vm1, %v317_v20  ;;  %340 = vmatprep.subr.msk.bf16.mxu1 %vm412_vm1, %v317_v20 }
  0x2d   :  { %322 = vmatpush3.bf16.xpose.msk.msra.mxu0 %vm412_vm1, %v317_v20  ;;  %348 = vmatpush3.bf16.xpose.msk.msra.mxu1 %vm412_vm1, %v317_v20 }
  0x2e   :  { %325 = vmatprep.subr.msk.bf16.mxu0 %vm412_vm1, %v323_v23  ;;  %341 = vmatprep.subr.msk.bf16.mxu1 %vm412_vm1, %v323_v23 }
  0x35   :  { %328 = vmatpush3.bf16.xpose.msk.msra.mxu0 %vm412_vm1, %v323_v23  ;;  %349 = vmatpush3.bf16.xpose.msk.msra.mxu1 %vm412_vm1, %v323_v23 }
  0x36   :  { %331 = vmatprep.subr.msk.bf16.mxu0 %vm412_vm1, %v329_v26  ;;  %342 = vmatprep.subr.msk.bf16.mxu1 %vm412_vm1, %v329_v26 }
  0x3d   :  { %334 = vmatpush3.bf16.xpose.msk.msra.mxu0 %vm412_vm1, %v329_v26  ;;  %350 = vmatpush3.bf16.xpose.msk.msra.mxu1 %vm412_vm1, %v329_v26 }
  0x44   :  { %282 = vmatmul.mubr.msk.f32.vlgmr.msra.gmra.mrb[0].mxu0 %vm42_vm0, %v16_v27  ;;  %285 = vmatmul.mubr.msk.f32.vlgmr.msra.gmra.mrb[0].mxu1 %vm42_vm0, %v18_v28 }
 0x117   :  { %v283_v30 = vpop.f32.mrb[0].mxu0  ;;  %v286_v31 = vpop.f32.mrb[0].mxu1 }
 0x118   :  { %v175_v32 = vadd.f32 %v283_v30, %v208_v29  ;;  %v185_v33 = vadd.f32 %v286_v31, %v208_v29  ;;  %v169_v34 = vpop.f32.mrb[1].mxu0  ;;  %v179_v35 = vpop.f32.mrb[1].mxu1 }
 0x119   :  { %v170_v36 = vadd.f32 %v208_v29, %v169_v34  ;;  %v180_v37 = vadd.f32 %v208_v29, %v179_v35 }
 0x11a   :  { %189 = vst [vmem:[#allocation2 + $0x8] sm:$0xff] %v175_v32  ;;  %191 = vst [vmem:[#allocation2 + $0x18] sm:$0xff] %v185_v33 }
 0x11b   :  { %188 = vst [vmem:[#allocation2] sm:$0xff] %v170_v36  ;;  %190 = vst [vmem:[#allocation2 + $0x10] sm:$0xff] %v180_v37 }
 0x11c   :  { %365 = shalt.err (!%p362_p4)
}
 0x11d   :  { %s366_s29 = scalar_lea.hbm %s553_s3, 512 }
 0x11e   :  { %p367_p5 = scmp.ne.s32.totalorder %s553_s3, %s366_s29  ;;  %p370_p6 = scmp.lt.u32.totalorder %s366_s29, %s553_s3 }
 0x120   :  { %p372_p7 = pnand %p370_p6, %p367_p5 }
 0x122   :  { %375 = shalt.err (!%p372_p7)
}
 0x123   :  { %s379_s7 = smov 128   ;;  %s380_s8 = smov 8  }
 0x124   :  { %203 = dma.vmem_to_hbm [thread:$0]  %s198_s27, 512, %s553_s3, [#allocation3], %s379_s7, %s379_s7, %s380_s8  }
 0x125   :  { %376 = dma.done.wait [#allocation3], 512  }
 0x126   :  { %377 = vsyncadd [#allocation3], 4294966784 }
 0x127   :  { %207 = vsyncpa [#allocation3], 1 }

</bundles_post_ra>
